<compile_context>
chip_gen: v6e
topology: v6e:2x2x1
jax: 0.10.0
libtpu: 0.0.40
codegen_flags: <defaults>
</compile_context>

<pallas_src>
import jax
import jax.numpy as jnp
from jax.experimental import pallas as pl
from jax.experimental.pallas import tpu as pltpu

LANES = 128
SUBLANES = 8


def _make_kernel(n_rows, inv_n, needs_mask):
    def kernel(f1_ref, f2_ref, y_ref, w1_ref, w2_ref, out_ref):
        i = pl.program_id(0)

        f1 = f1_ref[...].astype(jnp.float32)            # (T, C)
        f2 = f2_ref[...].astype(jnp.float32)            # (T, C)
        labels = y_ref[...]                             # (T, 1) int32
        t, c = f1.shape

        # One-hot label mask built once and shared by both views.
        col_ids = jax.lax.broadcasted_iota(jnp.int32, (t, c), 1)
        label_mask = col_ids == labels                  # broadcasts (T, 1)

        def ce_rows(logits):
            # log-softmax CE == F.cross_entropy(reduction='none')
            m = jnp.max(logits, axis=-1, keepdims=True)
            lse = m + jnp.log(jnp.sum(jnp.exp(logits - m), axis=-1,
                                      keepdims=True))
            lab = jnp.sum(jnp.where(label_mask, logits, 0.0), axis=-1,
                          keepdims=True)
            return lse - lab                            # (T, 1)

        ce = ce_rows(f1) + ce_rows(f2)                  # (T, 1)

        if needs_mask:
            # Mask out padded rows of the ragged last batch tile.
            row_ids = jax.lax.broadcasted_iota(jnp.int32, (t, 1), 0) + i * t
            ce = jnp.where(row_ids < n_rows, ce, 0.0)

        # mean over N (static) folded in as a multiply on the tile partial.
        partial = jnp.sum(ce) * jnp.float32(inv_n)

        # Weight terms: computed exactly once; they also initialize the
        # resident (1, 1) output accumulator.
        @pl.when(i == 0)
        def _():
            w1 = w1_ref[...].astype(jnp.float32)        # (R, 128) lane-dense
            w2 = w2_ref[...].astype(jnp.float32)
            dot = jnp.sum(w1 * w2)                      # == mm(w1 row, w2 col)
            l1_diff = jnp.abs(jnp.sum(jnp.abs(w1)) - jnp.sum(jnp.abs(w2)))
            out_ref[...] = jnp.full(
                out_ref.shape,
                jnp.abs(dot) + jnp.float32(0.001) * l1_diff,
                jnp.float32)

        out_ref[...] += partial

    return kernel


def _choose_tile_n(n, c, itemsize):
    # 2 logit inputs x double-buffering per row must fit comfortably under the
    # default scoped-VMEM limit (32 MiB on v6e/v7x; 16 MiB default on v5e).
    budget = 24 * 1024 * 1024
    per_row = 2 * 2 * c * itemsize
    t = int(min(budget // max(per_row, 1), 512))
    if t >= n:
        return n                      # full batch dim in one block
    return max(8, (t // 8) * 8)       # strict tiles must be a multiple of 8


def multi_view_loss(f1_out, f2_out, w1, w2, y):
    """Pallas implementation of MultiViewLoss.forward. Returns (1, 1) f32."""
    n, c = f1_out.shape
    assert f2_out.shape == (n, c)

    # Weights: flatten, zero-pad to a multiple of 8*128 elements, lay out as
    # (R, 128) so the dot / L1 reductions use full vregs (no (1, L) layout).
    l = w1.size
    assert w2.size == l, "w1 and w2 must have equal numel for mm"
    pad = (-l) % (SUBLANES * LANES)
    w1p = jnp.pad(jnp.reshape(w1, (-1,)), (0, pad)).reshape(-1, LANES)
    w2p = jnp.pad(jnp.reshape(w2, (-1,)), (0, pad)).reshape(-1, LANES)
    r = w1p.shape[0]

    y2d = jnp.reshape(y.astype(jnp.int32), (n, 1))

    tile_n = _choose_tile_n(n, c, f1_out.dtype.itemsize)
    grid = pl.cdiv(n, tile_n)
    needs_mask = (n % tile_n) != 0

    kernel = _make_kernel(n_rows=n, inv_n=1.0 / n, needs_mask=needs_mask)

    # The (1, 1) output block has a constant index map, so it stays resident
    # in VMEM across the whole grid and acts as the accumulator; the batch
    # axis is therefore "arbitrary" (sequential).
    return pl.pallas_call(
        kernel,
        out_shape=jax.ShapeDtypeStruct((1, 1), jnp.float32),
        grid=(grid,),
        in_specs=[
            pl.BlockSpec((tile_n, c), lambda i: (i, 0)),      # f1 logits tile
            pl.BlockSpec((tile_n, c), lambda i: (i, 0)),      # f2 logits tile
            pl.BlockSpec((tile_n, 1), lambda i: (i, 0)),      # labels tile
            pl.BlockSpec((r, LANES), lambda i: (0, 0)),       # w1 (resident)
            pl.BlockSpec((r, LANES), lambda i: (0, 0)),       # w2 (resident)
        ],
        out_specs=pl.BlockSpec((1, 1), lambda i: (0, 0)),
        compiler_params=pltpu.CompilerParams(
            dimension_semantics=("arbitrary",)),
    )(f1_out, f2_out, y2d, w1p, w2p)


def _reference(f1_out, f2_out, w1, w2, y):
    """Pure-JAX reference mirroring the PyTorch module (for sanity check)."""
    def ce(logits, labels):
        logp = jax.nn.log_softmax(logits, axis=-1)
        return -jnp.take_along_axis(logp, labels[:, None], axis=-1)[:, 0]

    f1_ce = ce(f1_out, y)
    f2_ce = ce(f2_out, y)
    diff = jnp.abs(jnp.sum(jnp.abs(w1)) - jnp.sum(jnp.abs(w2)))
    dot = jnp.dot(jnp.reshape(w1, (-1,)), jnp.reshape(w2, (-1,)))
    return jnp.mean(f1_ce + f2_ce) + jnp.abs(dot) + 0.001 * diff


if __name__ == "__main__":
    key = jax.random.PRNGKey(0)
    k1, k2, k3, k4, k5 = jax.random.split(key, 5)

    N, C = 8, 32          # batch, num classes
    W_SHAPE = (4, 16)     # arbitrary weight tensors (same numel required)

    f1_out = jax.random.normal(k1, (N, C), dtype=jnp.float32)
    f2_out = jax.random.normal(k2, (N, C), dtype=jnp.float32)
    w1 = jax.random.normal(k3, W_SHAPE, dtype=jnp.float32)
    w2 = jax.random.normal(k4, W_SHAPE, dtype=jnp.float32)
    y = jax.random.randint(k5, (N,), 0, C, dtype=jnp.int32)

    out = multi_view_loss(f1_out, f2_out, w1, w2, y)
    out = jax.block_until_ready(out)

    ref = _reference(f1_out, f2_out, w1, w2, y)
    assert out.shape == (1, 1)
    assert jnp.allclose(out[0, 0], ref, rtol=1e-5, atol=1e-5), (out, ref)

    print("KERNEL_OK")
</pallas_src>

<mosaic_0001>
module attributes {stable_mosaic.version = 11 : i64} {
  func.func @kernel(%arg0: i32, %arg1: memref<8x32xf32, #tpu.memory_space<vmem>>, %arg2: memref<8x32xf32, #tpu.memory_space<vmem>>, %arg3: memref<8x1xi32, #tpu.memory_space<vmem>>, %arg4: memref<8x128xf32, #tpu.memory_space<vmem>>, %arg5: memref<8x128xf32, #tpu.memory_space<vmem>>, %arg6: memref<1x1xf32, #tpu.memory_space<vmem>>) attributes {dimension_semantics = [#tpu.dimension_semantics<arbitrary>], iteration_bounds = array<i64: 1>, scalar_prefetch = 0 : i64, scratch_operands = 0 : i64, tpu.core_type = #tpu.core_type<tc>, window_params = [{transform_indices = @transform_0, window_bounds = array<i64: 8, 32>}, {transform_indices = @transform_1, window_bounds = array<i64: 8, 32>}, {transform_indices = @transform_2, window_bounds = array<i64: 8, 1>}, {pipeline_mode = #tpu.pipeline_mode<synchronous>, transform_indices = @transform_3, window_bounds = array<i64: 8, 128>}, {pipeline_mode = #tpu.pipeline_mode<synchronous>, transform_indices = @transform_4, window_bounds = array<i64: 8, 128>}, {pipeline_mode = #tpu.pipeline_mode<synchronous>, transform_indices = @transform_5, window_bounds = array<i64: 1, 1>}]} {
    %c0 = arith.constant 0 : index
    %c0_0 = arith.constant 0 : index
    %0 = vector.load %arg1[%c0, %c0_0] : memref<8x32xf32, #tpu.memory_space<vmem>>, vector<8x32xf32>
    %c0_1 = arith.constant 0 : index
    %c0_2 = arith.constant 0 : index
    %1 = vector.load %arg2[%c0_1, %c0_2] : memref<8x32xf32, #tpu.memory_space<vmem>>, vector<8x32xf32>
    %c0_3 = arith.constant 0 : index
    %c0_4 = arith.constant 0 : index
    %2 = vector.load %arg3[%c0_3, %c0_4] : memref<8x1xi32, #tpu.memory_space<vmem>>, vector<8x1xi32>
    %3 = tpu.iota {dimensions = array<i32: 1>} : vector<8x32xi32>
    %4 = vector.broadcast %2 : vector<8x1xi32> to vector<8x32xi32>
    %5 = arith.cmpi eq, %3, %4 : vector<8x32xi32>
    %cst = arith.constant dense<0xFF800000> : vector<8xf32>
    %6 = vector.multi_reduction <maximumf>, %0, %cst [1] : vector<8x32xf32> to vector<8xf32>
    %7 = vector.shape_cast %6 : vector<8xf32> to vector<8x1xf32>
    %8 = vector.broadcast %7 : vector<8x1xf32> to vector<8x32xf32>
    %9 = arith.subf %0, %8 : vector<8x32xf32>
    %10 = math.exp %9 : vector<8x32xf32>
    %cst_5 = arith.constant dense<0.000000e+00> : vector<8xf32>
    %11 = vector.multi_reduction <add>, %10, %cst_5 [1] : vector<8x32xf32> to vector<8xf32>
    %12 = vector.shape_cast %11 : vector<8xf32> to vector<8x1xf32>
    %13 = math.log %12 : vector<8x1xf32>
    %14 = arith.addf %7, %13 : vector<8x1xf32>
    %cst_6 = arith.constant 0.000000e+00 : f32
    %15 = vector.broadcast %cst_6 : f32 to vector<8x32xf32>
    %16 = arith.select %5, %0, %15 : vector<8x32xi1>, vector<8x32xf32>
    %cst_7 = arith.constant dense<0.000000e+00> : vector<8xf32>
    %17 = vector.multi_reduction <add>, %16, %cst_7 [1] : vector<8x32xf32> to vector<8xf32>
    %18 = vector.shape_cast %17 : vector<8xf32> to vector<8x1xf32>
    %19 = arith.subf %14, %18 : vector<8x1xf32>
    %cst_8 = arith.constant dense<0xFF800000> : vector<8xf32>
    %20 = vector.multi_reduction <maximumf>, %1, %cst_8 [1] : vector<8x32xf32> to vector<8xf32>
    %21 = vector.shape_cast %20 : vector<8xf32> to vector<8x1xf32>
    %22 = vector.broadcast %21 : vector<8x1xf32> to vector<8x32xf32>
    %23 = arith.subf %1, %22 : vector<8x32xf32>
    %24 = math.exp %23 : vector<8x32xf32>
    %cst_9 = arith.constant dense<0.000000e+00> : vector<8xf32>
    %25 = vector.multi_reduction <add>, %24, %cst_9 [1] : vector<8x32xf32> to vector<8xf32>
    %26 = vector.shape_cast %25 : vector<8xf32> to vector<8x1xf32>
    %27 = math.log %26 : vector<8x1xf32>
    %28 = arith.addf %21, %27 : vector<8x1xf32>
    %cst_10 = arith.constant 0.000000e+00 : f32
    %29 = vector.broadcast %cst_10 : f32 to vector<8x32xf32>
    %30 = arith.select %5, %1, %29 : vector<8x32xi1>, vector<8x32xf32>
    %cst_11 = arith.constant dense<0.000000e+00> : vector<8xf32>
    %31 = vector.multi_reduction <add>, %30, %cst_11 [1] : vector<8x32xf32> to vector<8xf32>
    %32 = vector.shape_cast %31 : vector<8xf32> to vector<8x1xf32>
    %33 = arith.subf %28, %32 : vector<8x1xf32>
    %34 = arith.addf %19, %33 : vector<8x1xf32>
    %35 = vector.shape_cast %34 : vector<8x1xf32> to vector<1x8x1xf32>
    %cst_12 = arith.constant dense<0.000000e+00> : vector<1xf32>
    %36 = vector.multi_reduction <add>, %35, %cst_12 [1, 2] : vector<1x8x1xf32> to vector<1xf32>
    %37 = vector.shape_cast %36 : vector<1xf32> to vector<1x1x1xf32>
    %38 = vector.extract %37[0, 0, 0] : f32 from vector<1x1x1xf32>
    %cst_13 = arith.constant 1.250000e-01 : f32
    %39 = arith.mulf %38, %cst_13 : f32
    %c0_i32 = arith.constant 0 : i32
    %40 = arith.cmpi eq, %arg0, %c0_i32 : i32
    %41 = arith.extui %40 : i1 to i32
    %c0_i32_14 = arith.constant 0 : i32
    %42 = arith.cmpi ne, %41, %c0_i32_14 : i32
    scf.if %42 {
      %c0_19 = arith.constant 0 : index
      %c0_20 = arith.constant 0 : index
      %47 = vector.load %arg4[%c0_19, %c0_20] : memref<8x128xf32, #tpu.memory_space<vmem>>, vector<8x128xf32>
      %c0_21 = arith.constant 0 : index
      %c0_22 = arith.constant 0 : index
      %48 = vector.load %arg5[%c0_21, %c0_22] : memref<8x128xf32, #tpu.memory_space<vmem>>, vector<8x128xf32>
      %49 = arith.mulf %47, %48 : vector<8x128xf32>
      %50 = vector.shape_cast %49 : vector<8x128xf32> to vector<1x8x128xf32>
      %cst_23 = arith.constant dense<0.000000e+00> : vector<1xf32>
      %51 = vector.multi_reduction <add>, %50, %cst_23 [1, 2] : vector<1x8x128xf32> to vector<1xf32>
      %52 = vector.shape_cast %51 : vector<1xf32> to vector<1x1x1xf32>
      %53 = vector.extract %52[0, 0, 0] : f32 from vector<1x1x1xf32>
      %54 = math.absf %47 : vector<8x128xf32>
      %55 = vector.shape_cast %54 : vector<8x128xf32> to vector<1x8x128xf32>
      %cst_24 = arith.constant dense<0.000000e+00> : vector<1xf32>
      %56 = vector.multi_reduction <add>, %55, %cst_24 [1, 2] : vector<1x8x128xf32> to vector<1xf32>
      %57 = vector.shape_cast %56 : vector<1xf32> to vector<1x1x1xf32>
      %58 = vector.extract %57[0, 0, 0] : f32 from vector<1x1x1xf32>
      %59 = math.absf %48 : vector<8x128xf32>
      %60 = vector.shape_cast %59 : vector<8x128xf32> to vector<1x8x128xf32>
      %cst_25 = arith.constant dense<0.000000e+00> : vector<1xf32>
      %61 = vector.multi_reduction <add>, %60, %cst_25 [1, 2] : vector<1x8x128xf32> to vector<1xf32>
      %62 = vector.shape_cast %61 : vector<1xf32> to vector<1x1x1xf32>
      %63 = vector.extract %62[0, 0, 0] : f32 from vector<1x1x1xf32>
      %64 = arith.subf %58, %63 : f32
      %65 = math.absf %64 : f32
      %66 = math.absf %53 : f32
      %cst_26 = arith.constant 1.000000e-03 : f32
      %67 = arith.mulf %cst_26, %65 : f32
      %68 = arith.addf %66, %67 : f32
      %69 = vector.broadcast %68 : f32 to vector<1x1xf32>
      %c0_27 = arith.constant 0 : index
      %c0_28 = arith.constant 0 : index
      %70 = vector.load %arg6[%c0_27, %c0_28] : memref<1x1xf32, #tpu.memory_space<vmem>>, vector<1x1xf32>
      tpu.vector_store %arg6[%c0_27, %c0_28], %69 {strides = array<i32>} : memref<1x1xf32, #tpu.memory_space<vmem>>, vector<1x1xf32>,
    } else {
    }
    %c0_15 = arith.constant 0 : index
    %c0_16 = arith.constant 0 : index
    %43 = vector.load %arg6[%c0_15, %c0_16] : memref<1x1xf32, #tpu.memory_space<vmem>>, vector<1x1xf32>
    %44 = vector.broadcast %39 : f32 to vector<1x1xf32>
    %45 = arith.addf %43, %44 : vector<1x1xf32>
    %c0_17 = arith.constant 0 : index
    %c0_18 = arith.constant 0 : index
    %46 = vector.load %arg6[%c0_17, %c0_18] : memref<1x1xf32, #tpu.memory_space<vmem>>, vector<1x1xf32>
    tpu.vector_store %arg6[%c0_17, %c0_18], %45 {strides = array<i32>} : memref<1x1xf32, #tpu.memory_space<vmem>>, vector<1x1xf32>,
    return
  }
  func.func @transform_0(%arg0: i32) -> (i32, i32) {
    %c0_i32 = arith.constant 0 : i32
    %c0_i32_0 = arith.constant 0 : i32
    return %arg0, %c0_i32 : i32, i32
  }
  func.func @transform_1(%arg0: i32) -> (i32, i32) {
    %c0_i32 = arith.constant 0 : i32
    %c0_i32_0 = arith.constant 0 : i32
    return %arg0, %c0_i32 : i32, i32
  }
  func.func @transform_2(%arg0: i32) -> (i32, i32) {
    %c0_i32 = arith.constant 0 : i32
    %c0_i32_0 = arith.constant 0 : i32
    return %arg0, %c0_i32 : i32, i32
  }
  func.func @transform_3(%arg0: i32) -> (i32, i32) {
    %c0_i32 = arith.constant 0 : i32
    %c0_i32_0 = arith.constant 0 : i32
    %c0_i32_1 = arith.constant 0 : i32
    return %c0_i32, %c0_i32_0 : i32, i32
  }
  func.func @transform_4(%arg0: i32) -> (i32, i32) {
    %c0_i32 = arith.constant 0 : i32
    %c0_i32_0 = arith.constant 0 : i32
    %c0_i32_1 = arith.constant 0 : i32
    return %c0_i32, %c0_i32_0 : i32, i32
  }
  func.func @transform_5(%arg0: i32) -> (i32, i32) {
    %c0_i32 = arith.constant 0 : i32
    %c0_i32_0 = arith.constant 0 : i32
    %c0_i32_1 = arith.constant 0 : i32
    return %c0_i32, %c0_i32_0 : i32, i32
  }
}

</mosaic_0001>

<bundles_post_ra>
// kernel: tpu_custom_call.1
= control target key start
LH: loop header
LB: loop body
LE: loop exit
PB: predicated region body
PF: predicated region fallthrough
CT: control target
= control target key end

     0   :  { %10 = vsyncpa [#allocation3], 0  ;;  %s313_s0 = inlined_call_operand.vmem [shape: f32[8,32], index: 0, kind: input, shape index: {}]   ;;  %s314_s1 = inlined_call_operand.hbm [shape: f32[8,32], index: 1, kind: input, shape index: {}]   ;;  %s315_s2 = inlined_call_operand.vmem [shape: s32[8,1], index: 2, kind: input, shape index: {}]   ;;  %s316_s3 = inlined_call_operand.hbm [shape: f32[8,128], index: 3, kind: input, shape index: {}]   ;;  %s317_s4 = inlined_call_operand.vmem [shape: f32[8,128], index: 4, kind: input, shape index: {}]   ;;  %s318_s5 = inlined_call_operand.hbm [shape: f32[1,1], index: 5, kind: output, shape index: {}]  }
   0x1   :  { %11 = vsyncpa [#allocation6], 0 }
   0x2   :  { %12 = vsyncpa [#allocation4], 0  ;;  %s255_s18 = smov [#allocation2]   ;;  %s256_s20 = smov [#allocation5]  }
   0x3   :  { %s21_s19 = sshll.u32 %s255_s18, 4  ;;  %s33_s21 = sshll.u32 %s256_s20, 4  ;;  %s22_s19 = int_to_ptr.vmem [resolvable:$true] %s21_s19  ;;  %s34_s21 = int_to_ptr.vmem [resolvable:$true] %s33_s21 }
   0x4   :  { %s197_s22 = scalar_lea.vmem %s22_s19, 128  ;;  %p202_p1 = scmp.lt.s32.totalorder %s22_s19, %s22_s19 }
   0x5   :  { %p198_p0 = scmp.ne.s32.totalorder %s22_s19, %s197_s22  ;;  %p203_p2 = scmp.lt.s32.totalorder %s197_s22, %s197_s22 }
   0x7   :  { %p204_p3 = por %p203_p2, %p202_p1 }
   0x9   :  { %p205_p4 = pnand %p204_p3, %p198_p0 }
   0xb   :  { %208 = shalt.err (!%p205_p4)
}
   0xc   :  { %24 = dma.hbm_to_vmem [thread:$0]  %s314_s1, 128, %s22_s19, [#allocation3]  }
   0xd   :  { %s217_s25 = scalar_lea.vmem %s34_s21, 128  ;;  %p222_p6 = scmp.lt.s32.totalorder %s34_s21, %s34_s21 }
   0xe   :  { %p218_p5 = scmp.ne.s32.totalorder %s34_s21, %s217_s25  ;;  %p223_p7 = scmp.lt.s32.totalorder %s217_s25, %s217_s25 }
  0x10   :  { %p224_p8 = por %p223_p7, %p222_p6 }
  0x12   :  { %p225_p9 = pnand %p224_p8, %p218_p5 }
  0x14   :  { %228 = shalt.err (!%p225_p9)
}
  0x15   :  { %36 = dma.hbm_to_vmem [thread:$0]  %s316_s3, 128, %s34_s21, [#allocation6]  }
  0x16   :  { %249 = dma.done.wait [#allocation3], 128  }
  0x17   :  { %250 = vsyncadd [#allocation3], 4294967168 }
  0x18   :  { %251 = dma.done.wait [#allocation6], 128  }
  0x19   :  { %252 = vsyncadd [#allocation6], 4294967168  ;;  %v257_v0 = vmov 0   ;;  %vm54_vm0 = vcmask 261120   ;;  %v45_v1 = vld [vmem:[%s313_s0] sm:$0xff]  ;;  %v48_v12 = vlaneseq  ;;  %v106_v23 = vld [vmem:[#allocation5] sm:$0xff] }
  0x1a   :  { %179 = vset.pattern.permute.xlu1 %v257_v0  ;;  %180 = vset.pattern.permute.xlu0 %v257_v0  ;;  %v46_v2 = vld [vmem:[#allocation2] sm:$0xff]  ;;  %v55_v4 = vsel %vm54_vm0, %v45_v1, -inf  ;;  %v118_v26 = vand.u32 2147483647, %v106_v23  ;;  %vm90_vm2 = vcmask 7168   ;;  %vm144_vm3 = vcmask 0  }
  0x1b   :  { %v47_v3 = vld [vmem:[%s315_s2] sm:$0xff]  ;;  %56 = vmax.xlane.f32.xlu0 %v55_v4  ;;  %v72_v5 = vsel %vm54_vm0, %v46_v2, -inf  ;;  %v49_v13 = vand.u32 127, %v48_v12  ;;  %s258_s14 = smov [#allocation7]  }
  0x1c   :  { %51 = vperm.xlu1 %179, %v47_v3   ;;  %v107_v24 = vld [vmem:[%s317_s4] sm:$0xff]  ;;  %s157_s15 = sshll.u32 %s258_s14, 4  ;;  %s158_s15 = int_to_ptr.vmem [resolvable:$true] %s157_s15 }
  0x1d   :  { %v108_v25 = vmul.f32 %v107_v24, %v106_v23  ;;  %v128_v41 = vand.u32 2147483647, %v107_v24  ;;  %s229_s16 = scalar_lea.vmem %s158_s15, 16  ;;  %s233_s17 = scalar_lea.vmem %s158_s15, 32 }
  0x1e   :  { %p230_p10 = scmp.ne.s32.totalorder %s158_s15, %s229_s16  ;;  %p234_p11 = scmp.lt.s32.totalorder %s158_s15, %s158_s15 }
  0x1f   :  { %73 = vmax.xlane.f32.xlu0 %v72_v5  ;;  %p235_p12 = scmp.lt.s32.totalorder %s233_s17, %s229_s16 }
  0x21   :  { %p236_p13 = por %p235_p12, %p234_p11 }
  0x23   :  { %p237_p0 = pnand %p236_p13, %p230_p10 }
  0x97   :  { %v52_v14 = vpop.permute.xlu1 %51 }
  0x98   :  { %vm53_vm1 = vcmp.eq.s32.totalorder %v49_v13, %v52_v14 }
  0x99   :  { %v67_v18 = vsel %vm53_vm1, %v45_v1, 0.0  ;;  %v84_v21 = vsel %vm53_vm1, %v46_v2, 0.0 }
  0x9a   :  { %v68_v20 = vsel %vm54_vm0, %v67_v18, 0.0  ;;  %v85_v22 = vsel %vm54_vm0, %v84_v21, 0.0 }
  0xa4   :  { %v57_v6 = vpop.xlane.xlu0 %56 }
  0xa5   :  { %v58_v7 = vsub.f32 %v45_v1, %v57_v6 }
  0xa7   :  { %v59_v8 = vmul.f32 1.442695, %v58_v7 }
  0xa8   :  { %v74_v9 = vpop.xlane.xlu0 %73 }
  0xa9   :  { %181 = vpow2.f32 %v59_v8  ;;  %v75_v10 = vsub.f32 %v46_v2, %v74_v9 }
  0xab   :  { %v76_v11 = vmul.f32 1.442695, %v75_v10 }
  0xad   :  { %183 = vpow2.f32 %v76_v11 }
  0xb6   :  { %v182_v15 = vpop.eup %181 }
  0xb7   :  { %v61_v16 = vsel %vm54_vm0, %v182_v15, 0.0 }
  0xb8   :  { %62 = vadd.xlane.f32.xlu1 %v61_v16 }
  0xba   :  { %v184_v17 = vpop.eup %183 }
  0xbb   :  { %v78_v19 = vsel %vm54_vm0, %v184_v17, 0.0 }
  0xbc   :  { %79 = vadd.xlane.f32.xlu0 %v78_v19 }
  0xc0   :  { %69 = vadd.xlane.f32.xlu0 %v68_v20 }
  0xc4   :  { %86 = vadd.xlane.f32.xlu0 %v85_v22 }
  0xc8   :  { %109 = vadd.xlane.f32.xlu0 %v108_v25 }
  0xcc   :  { %119 = vadd.xlane.f32.xlu0 %v118_v26 }
 0x141   :  { %v63_v27 = vpop.xlane.xlu1 %62 }
 0x142   :  { %185 = vlog2.f32 %v63_v27 }
 0x145   :  { %v80_v28 = vpop.xlane.xlu0 %79 }
 0x146   :  { %187 = vlog2.f32 %v80_v28 }
 0x149   :  { %v70_v31 = vpop.xlane.xlu0 %69 }
 0x14d   :  { %v87_v36 = vpop.xlane.xlu0 %86 }
 0x14f   :  { %v186_v29 = vpop.eup %185 }
 0x150   :  { %v65_v30 = vmul.f32 0.6931472, %v186_v29 }
 0x151   :  { %v110_v42 = vpop.xlane.xlu0 %109 }
 0x152   :  { %v66_v34 = vadd.f32 %v65_v30, %v57_v6  ;;  %v111_v44 = vrot.slane %v110_v42, 4 }
 0x153   :  { %v188_v32 = vpop.eup %187 }
 0x154   :  { %v82_v33 = vmul.f32 0.6931472, %v188_v32  ;;  %v71_v37 = vsub.f32 %v66_v34, %v70_v31  ;;  %v112_v46 = vadd.f32 %v111_v44, %v110_v42 }
 0x155   :  { %v120_v43 = vpop.xlane.xlu0 %119 }
 0x156   :  { %v83_v35 = vadd.f32 %v82_v33, %v74_v9  ;;  %v121_v45 = vrot.slane %v120_v43, 4  ;;  %v113_v48 = vrot.slane %v112_v46, 2 }
 0x158   :  { %v88_v38 = vsub.f32 %v83_v35, %v87_v36  ;;  %v122_v47 = vadd.f32 %v121_v45, %v120_v43  ;;  %v114_v54 = vadd.f32 %v113_v48, %v112_v46 }
 0x15a   :  { %v89_v39 = vadd.f32 %v88_v38, %v71_v37  ;;  %v123_v50 = vrot.slane %v122_v47, 2  ;;  %v115_v60 = vrot.slane %v114_v54, 1 }
 0x15c   :  { %v91_v40 = vsel %vm90_vm2, %v89_v39, 0.0  ;;  %v124_v57 = vadd.f32 %v123_v50, %v122_v47  ;;  %v116_v2 = vadd.f32 %v115_v60, %v114_v54 }
 0x15d   :  { %92 = vadd.xlane.f32.xlu0 %v91_v40 }
 0x15e   :  { %v125_v63 = vrot.slane %v124_v57, 1 }
 0x160   :  { %v126_v3 = vadd.f32 %v125_v63, %v124_v57 }
 0x161   :  { %129 = vadd.xlane.f32.xlu0 %v128_v41 }
 0x1e6   :  { %v93_v49 = vpop.xlane.xlu0 %92 }
 0x1e7   :  { %v94_v51 = vrot.slane %v93_v49, 4 }
 0x1e9   :  { %v95_v52 = vadd.f32 %v94_v51, %v93_v49 }
 0x1ea   :  { %v130_v53 = vpop.xlane.xlu0 %129 }
 0x1eb   :  { %v96_v55 = vrot.slane %v95_v52, 2  ;;  %v131_v56 = vrot.slane %v130_v53, 4 }
 0x1ed   :  { %v132_v58 = vadd.f32 %v131_v56, %v130_v53  ;;  %v97_v59 = vadd.f32 %v96_v55, %v95_v52 }
 0x1ef   :  { %v133_v61 = vrot.slane %v132_v58, 2  ;;  %v98_v62 = vrot.slane %v97_v59, 1 }
 0x1f1   :  { %v134_v0 = vadd.f32 %v133_v61, %v132_v58  ;;  %v99_v1 = vadd.f32 %v98_v62, %v97_v59 }
 0x1f3   :  { %167 = vpush %v99_v1  ;;  %v135_v4 = vrot.slane %v134_v0, 1 }
 0x1f4   :  { %169 = vpush %v116_v2 }
 0x1f5   :  { %171 = vpush %v126_v3  ;;  %v136_v5 = vadd.f32 %v135_v4, %v134_v0 }
 0x1f7   :  { %173 = vpush %v136_v5 }
 0x224   :  { %s168_s3 = spop %167 }
 0x225   :  { %s170_s4 = spop %169  ;;  %s101_s13 = smul.f32 0.125, %s168_s3 }
 0x226   :  { %s172_s6 = spop %171  ;;  %s140_s11 = sand.u32 2147483647, %s170_s4 }
 0x227   :  { %v147_v7 = vstv %s101_s13 }
 0x228   :  { %s174_s7 = spop %173 }
 0x229   :  { %s138_s8 = ssub.f32 %s172_s6, %s174_s7 }
 0x22b   :  { %s139_s9 = sand.u32 2147483647, %s138_s8 }
 0x22c   :  { %s141_s10 = smul.f32 0.001, %s139_s9 }
 0x22e   :  { %s142_s12 = sadd.f32 %s141_s10, %s140_s11 }
 0x230   :  { %v143_v6 = vstv %s142_s12 }
 0x231   :  { %145 = vst.msk [vmem:[#allocation7] sm:$0x1] %vm144_vm3, %v143_v6 }
 0x238   :  { %v146_v8 = vld [vmem:[#allocation7] sm:$0x1] }
 0x239   :  { %v148_v9 = vadd.f32 %v147_v7, %v146_v8 }
 0x23b   :  { %150 = vst.msk [vmem:[#allocation7] sm:$0x1] %vm144_vm3, %v148_v9 }
 0x23c   :  { %240 = shalt.err (!%p237_p0)
}
 0x23d   :  { %160 = dma.vmem_to_hbm [thread:$0]  %s158_s15, 16, %s318_s5, [#allocation4]  }
 0x23e   :  { %253 = dma.done.wait [#allocation4], 16  }
 0x23f   :  { %254 = vsyncadd [#allocation4], 4294967280 }
 0x240   :  { %164 = vsyncpa [#allocation3], 1 }
 0x241   :  { %165 = vsyncpa [#allocation6], 1 }
 0x242   :  { %166 = vsyncpa [#allocation4], 1 }

</bundles_post_ra>
